<compile_context>
chip_gen: v7x
topology: tpu7x:2x2x1
jax: 0.10.0
libtpu: 0.0.40
codegen_flags: <defaults>
</compile_context>

<pallas_src>
import jax
import jax.numpy as jnp
from jax.experimental import pallas as pl
from jax.experimental.pallas import tpu as pltpu


def _round_up(x, m):
    return ((x + m - 1) // m) * m


def _decoder_mlp_kernel(x_ref, w1_ref, b1_ref, w2_ref, b2_ref, o_ref):
    # In-kernel bf16 cast of the activations (hidden under the input DMA).
    x = x_ref[...].astype(w1_ref.dtype)                       # (TILE_B, F) bf16

    # Hidden layer: bf16 MXU matmul with f32 accumulation; bias + ReLU in f32.
    # Padded hidden lanes have zero weights/zero bias -> stay exactly 0.
    h = jnp.dot(x, w1_ref[...], preferred_element_type=jnp.float32)
    h = jnp.maximum(h + b1_ref[...], 0.0)                     # (TILE_B, Hp) f32

    # Output layer (padded hidden rows of W2 are zero -> no contribution).
    logits = jnp.dot(h.astype(w2_ref.dtype), w2_ref[...],
                     preferred_element_type=jnp.float32)
    logits = logits + b2_ref[...]                             # (TILE_B, L) f32

    # Softmax over the class (lane) axis == torch Softmax(dim=1) on 2-D input.
    m = jnp.max(logits, axis=-1, keepdims=True)
    e = jnp.exp(logits - m)
    denom = jnp.sum(e, axis=-1, keepdims=True)
    # Exact normalization (no approx reciprocal): rows must sum to 1.
    o_ref[...] = (e / denom).astype(o_ref.dtype)


def decoder_mlp_multiclass(x, w1, b1, w2, b2, *, compute_dtype=jnp.bfloat16):
    """x: (B, F) f32; w1: (F, H); b1: (1, H) or (H,); w2: (H, L); b2: (1, L) or (L,)."""
    B, F = x.shape
    H = w1.shape[1]
    L = w2.shape[1]

    # --- batch tiling -------------------------------------------------------
    # HBM / per-step-overhead bound kernel: use big tiles (VMEM need is a few
    # MiB at most) but guarantee >= 2 grid steps so both v7x TensorCores are
    # fed.  tile_b is a multiple of 8 (sublane); the last block may be ragged
    # (the computation is purely row-wise, so masked OOB rows are harmless).
    if B <= 8:
        tile_b = _round_up(max(B, 1), 8)
    else:
        tile_b = min(1024, _round_up(pl.cdiv(B, 2), 8))
    grid = (pl.cdiv(B, tile_b),)

    # --- hidden dim padded to a lane-native 128 (zero pad -> exact math) ----
    h_pad = _round_up(max(H, 128), 128)
    w1_p = (jnp.zeros((F, h_pad), jnp.float32).at[:, :H].set(w1)
            .astype(compute_dtype))
    b1_p = jnp.zeros((1, h_pad), jnp.float32).at[:, :H].set(
        b1.reshape(1, H).astype(jnp.float32))
    w2_p = (jnp.zeros((h_pad, L), jnp.float32).at[:H, :].set(w2)
            .astype(compute_dtype))
    b2_c = b2.reshape(1, L).astype(jnp.float32)

    # --- scheduler hint -----------------------------------------------------
    wsize = jnp.dtype(compute_dtype).itemsize
    flops = 2 * B * (F * h_pad + h_pad * L)
    bytes_accessed = (x.size * x.dtype.itemsize
                      + w1_p.size * wsize + w2_p.size * wsize
                      + b1_p.size * 4 + b2_c.size * 4
                      + B * L * 4)
    cost = pl.CostEstimate(flops=flops, transcendentals=B * L,
                           bytes_accessed=bytes_accessed)

    return pl.pallas_call(
        _decoder_mlp_kernel,
        out_shape=jax.ShapeDtypeStruct((B, L), jnp.float32),
        grid_spec=pltpu.PrefetchScalarGridSpec(
            num_scalar_prefetch=0,
            grid=grid,
            in_specs=[
                pl.BlockSpec((tile_b, F), lambda i: (i, 0)),   # x: tiled over batch
                pl.BlockSpec((F, h_pad), lambda i: (0, 0)),    # w1: resident
                pl.BlockSpec((1, h_pad), lambda i: (0, 0)),    # b1: resident
                pl.BlockSpec((h_pad, L), lambda i: (0, 0)),    # w2: resident
                pl.BlockSpec((1, L), lambda i: (0, 0)),        # b2: resident
            ],
            out_specs=pl.BlockSpec((tile_b, L), lambda i: (i, 0)),
        ),
        compiler_params=pltpu.CompilerParams(
            dimension_semantics=("parallel",),   # v7x: shard batch across both TCs
        ),
        cost_estimate=cost,
    )(x, w1_p, b1_p, w2_p, b2_c)


def _init_linear(key, fan_in, fan_out):
    """Deterministic PyTorch-Linear-style init: U(-1/sqrt(fan_in), 1/sqrt(fan_in)).

    Returns weight already transposed to (fan_in, fan_out) plus bias (1, fan_out).
    """
    kw, kb = jax.random.split(key)
    bound = 1.0 / jnp.sqrt(jnp.float32(fan_in))
    w = jax.random.uniform(kw, (fan_in, fan_out), jnp.float32, -bound, bound)
    b = jax.random.uniform(kb, (1, fan_out), jnp.float32, -bound, bound)
    return w, b


if __name__ == "__main__":
    # Small shapes consistent with the module's forward; B chosen so that the
    # ragged-final-block + 2-step-grid path is exercised.
    B, IN_FEATURES, HIDDEN_DIM, LATENT_DIM = 200, 32, 64, 16

    key = jax.random.PRNGKey(0)
    kx, k1, k2 = jax.random.split(key, 3)

    x = jax.random.normal(kx, (B, IN_FEATURES), jnp.float32)
    w1, b1 = _init_linear(k1, IN_FEATURES, HIDDEN_DIM)
    w2, b2 = _init_linear(k2, HIDDEN_DIM, LATENT_DIM)

    out = decoder_mlp_multiclass(x, w1, b1, w2, b2)
    out = jax.block_until_ready(out)

    # Pure-JAX f32 reference of the same semantics.  bf16 MXU operands ->
    # relaxed elementwise tolerance; softmax outputs are <= 1 so absolute
    # tolerance is meaningful.  Normalization is exact, so rows sum to 1.
    h_ref = jnp.maximum(x @ w1 + b1, 0.0)
    ref = jax.nn.softmax(h_ref @ w2 + b2, axis=1)
    assert out.shape == (B, LATENT_DIM)
    assert jnp.allclose(out, ref, atol=2e-2, rtol=2e-2)
    assert jnp.allclose(jnp.sum(out, axis=1), 1.0, atol=2e-3)

    print("KERNEL_OK")
</pallas_src>

<mosaic_0001>
module attributes {stable_mosaic.version = 11 : i64} {
  func.func @_decoder_mlp_kernel(%arg0: i32, %arg1: memref<104x32xf32, #tpu.memory_space<vmem>>, %arg2: memref<32x128xbf16, #tpu.memory_space<vmem>>, %arg3: memref<1x128xf32, #tpu.memory_space<vmem>>, %arg4: memref<128x16xbf16, #tpu.memory_space<vmem>>, %arg5: memref<1x16xf32, #tpu.memory_space<vmem>>, %arg6: memref<104x16xf32, #tpu.memory_space<vmem>>) attributes {dimension_semantics = [#tpu.dimension_semantics<parallel>], iteration_bounds = array<i64: 2>, scalar_prefetch = 0 : i64, scratch_operands = 0 : i64, tpu.core_type = #tpu.core_type<tc>, window_params = [{transform_indices = @transform_0, window_bounds = array<i64: 104, 32>}, {pipeline_mode = #tpu.pipeline_mode<synchronous>, transform_indices = @transform_1, window_bounds = array<i64: 32, 128>}, {pipeline_mode = #tpu.pipeline_mode<synchronous>, transform_indices = @transform_2, window_bounds = array<i64: 1, 128>}, {pipeline_mode = #tpu.pipeline_mode<synchronous>, transform_indices = @transform_3, window_bounds = array<i64: 128, 16>}, {pipeline_mode = #tpu.pipeline_mode<synchronous>, transform_indices = @transform_4, window_bounds = array<i64: 1, 16>}, {transform_indices = @transform_5, window_bounds = array<i64: 104, 16>}]} {
    %c0 = arith.constant 0 : index
    %c0_0 = arith.constant 0 : index
    %0 = vector.load %arg1[%c0, %c0_0] : memref<104x32xf32, #tpu.memory_space<vmem>>, vector<104x32xf32>
    %1 = arith.truncf %0 : vector<104x32xf32> to vector<104x32xbf16>
    %c0_1 = arith.constant 0 : index
    %c0_2 = arith.constant 0 : index
    %2 = vector.load %arg2[%c0_1, %c0_2] : memref<32x128xbf16, #tpu.memory_space<vmem>>, vector<32x128xbf16>
    %cst = arith.constant dense<0.000000e+00> : vector<104x128xf32>
    %3 = tpu.matmul %1, %2, %cst {dimension_numbers = #tpu.dot_dimension_numbers<[1], [0], [0], [1], [0, 0, 1, 1], [], []>} : vector<104x32xbf16>, vector<32x128xbf16>, vector<104x128xf32> -> vector<104x128xf32>
    %c0_3 = arith.constant 0 : index
    %c0_4 = arith.constant 0 : index
    %4 = vector.load %arg3[%c0_3, %c0_4] : memref<1x128xf32, #tpu.memory_space<vmem>>, vector<1x128xf32>
    %5 = vector.broadcast %4 : vector<1x128xf32> to vector<104x128xf32>
    %6 = arith.addf %3, %5 : vector<104x128xf32>
    %cst_5 = arith.constant 0.000000e+00 : f32
    %7 = vector.broadcast %cst_5 : f32 to vector<104x128xf32>
    %8 = arith.maximumf %6, %7 : vector<104x128xf32>
    %9 = arith.truncf %8 : vector<104x128xf32> to vector<104x128xbf16>
    %c0_6 = arith.constant 0 : index
    %c0_7 = arith.constant 0 : index
    %10 = vector.load %arg4[%c0_6, %c0_7] : memref<128x16xbf16, #tpu.memory_space<vmem>>, vector<128x16xbf16>
    %cst_8 = arith.constant dense<0.000000e+00> : vector<104x16xf32>
    %11 = tpu.matmul %9, %10, %cst_8 {dimension_numbers = #tpu.dot_dimension_numbers<[1], [0], [0], [1], [0, 0, 1, 1], [], []>} : vector<104x128xbf16>, vector<128x16xbf16>, vector<104x16xf32> -> vector<104x16xf32>
    %c0_9 = arith.constant 0 : index
    %c0_10 = arith.constant 0 : index
    %12 = vector.load %arg5[%c0_9, %c0_10] : memref<1x16xf32, #tpu.memory_space<vmem>>, vector<1x16xf32>
    %13 = vector.broadcast %12 : vector<1x16xf32> to vector<104x16xf32>
    %14 = arith.addf %11, %13 : vector<104x16xf32>
    %cst_11 = arith.constant dense<0xFF800000> : vector<104xf32>
    %15 = vector.multi_reduction <maximumf>, %14, %cst_11 [1] : vector<104x16xf32> to vector<104xf32>
    %16 = vector.shape_cast %15 : vector<104xf32> to vector<104x1xf32>
    %17 = vector.broadcast %16 : vector<104x1xf32> to vector<104x16xf32>
    %18 = arith.subf %14, %17 : vector<104x16xf32>
    %19 = math.exp %18 : vector<104x16xf32>
    %cst_12 = arith.constant dense<0.000000e+00> : vector<104xf32>
    %20 = vector.multi_reduction <add>, %19, %cst_12 [1] : vector<104x16xf32> to vector<104xf32>
    %21 = vector.shape_cast %20 : vector<104xf32> to vector<104x1xf32>
    %22 = vector.broadcast %21 : vector<104x1xf32> to vector<104x16xf32>
    %23 = arith.divf %19, %22 : vector<104x16xf32>
    %c0_13 = arith.constant 0 : index
    %c0_14 = arith.constant 0 : index
    %24 = vector.load %arg6[%c0_13, %c0_14] : memref<104x16xf32, #tpu.memory_space<vmem>>, vector<104x16xf32>
    tpu.vector_store %arg6[%c0_13, %c0_14], %23 {strides = array<i32>} : memref<104x16xf32, #tpu.memory_space<vmem>>, vector<104x16xf32>,
    return
  }
  func.func @transform_0(%arg0: i32) -> (i32, i32) {
    %c0_i32 = arith.constant 0 : i32
    %c0_i32_0 = arith.constant 0 : i32
    return %arg0, %c0_i32 : i32, i32
  }
  func.func @transform_1(%arg0: i32) -> (i32, i32) {
    %c0_i32 = arith.constant 0 : i32
    %c0_i32_0 = arith.constant 0 : i32
    %c0_i32_1 = arith.constant 0 : i32
    return %c0_i32, %c0_i32_0 : i32, i32
  }
  func.func @transform_2(%arg0: i32) -> (i32, i32) {
    %c0_i32 = arith.constant 0 : i32
    %c0_i32_0 = arith.constant 0 : i32
    %c0_i32_1 = arith.constant 0 : i32
    return %c0_i32, %c0_i32_0 : i32, i32
  }
  func.func @transform_3(%arg0: i32) -> (i32, i32) {
    %c0_i32 = arith.constant 0 : i32
    %c0_i32_0 = arith.constant 0 : i32
    %c0_i32_1 = arith.constant 0 : i32
    return %c0_i32, %c0_i32_0 : i32, i32
  }
  func.func @transform_4(%arg0: i32) -> (i32, i32) {
    %c0_i32 = arith.constant 0 : i32
    %c0_i32_0 = arith.constant 0 : i32
    %c0_i32_1 = arith.constant 0 : i32
    return %c0_i32, %c0_i32_0 : i32, i32
  }
  func.func @transform_5(%arg0: i32) -> (i32, i32) {
    %c0_i32 = arith.constant 0 : i32
    %c0_i32_0 = arith.constant 0 : i32
    return %arg0, %c0_i32 : i32, i32
  }
}

</mosaic_0001>

<bundles_post_ra>
// kernel: tpu_custom_call.1
= control target key start
LH: loop header
LB: loop body
LE: loop exit
PB: predicated region body
PF: predicated region fallthrough
CT: control target
= control target key end

     0   :  { %s1432_s18 = smov 0   ;;  %s1434_s19 = smov 0   ;;  %s1851_s0 = inlined_call_operand.vmem [shape: f32[200,32], index: 0, kind: input, shape index: {}]   ;;  %s1852_s1 = inlined_call_operand.vmem [shape: bf16[32,128], index: 1, kind: input, shape index: {}]   ;;  %s1853_s2 = inlined_call_operand.vmem [shape: f32[1,128], index: 2, kind: input, shape index: {}]   ;;  %s1854_s3 = inlined_call_operand.vmem [shape: bf16[128,16], index: 3, kind: input, shape index: {}]   ;;  %s1855_s4 = inlined_call_operand.vmem [shape: f32[1,16], index: 4, kind: input, shape index: {}]   ;;  %s1856_s5 = inlined_call_operand.vmem [shape: f32[200,16], index: 5, kind: output, shape index: {}]  }
   0x1   :  { %s1436_s20 = smov 0  }
   0x2 LB: > { %s1445_s21 = sadd.s32 4294967295, %s1366_s20   ;;  %s1447_s22 = sadd.s32 1, %s1366_s20   ;;  %s1366_s20 = sphi %s1436_s20, %s1863_s20   ;;  %s1362_s19 = sphi %s1434_s19, %s1862_s19   ;;  %s1358_s18 = sphi %s1432_s18, %s1861_s18  }
   0x3   : > { %s129_s23 = ssub.s32 %s1366_s20, %s1447_s22  ;;  %s132_s24 = sadd.s32 1, %s1362_s19 }
   0x4   : > { %p130_p0 = scmp.eq.s32.totalorder %s129_s23, 0  ;;  %p142_p1 = scmp.ne.s32.totalorder %s1362_s19, %s1358_s18 }
   0x5   : > { %p143_p2 = scmp.eq.s32.totalorder %s1445_s21, 1  ;;  %p1004_p3 = scmp.ge.s32.totalorder %s1366_s20, 1 }
   0x6   : > { %s1455_s25 = scalar_select %p130_p0, %s1362_s19, %s132_s24  }
   0x7   : > { %p1457_p4 = por %p143_p2, %p142_p1  ;;  %p196_p5 = scmp.lt.s32.totalorder %s1366_s20, 3 }
   0x9   : > { %p197_p6 = pnand %p1004_p3, %p196_p5 }
   0xa   : > { %v1246_v0 = vld [vmem:[%s1852_s1] sm:$0xff] (!%p197_p6)   ;;  %v1400_v1 = vmov (!%p197_p6), 0.0   ;;  %v1247_v2 = vld [vmem:[%s1852_s1 + $0x8] sm:$0xff] (!%p197_p6)   ;;  %vm1401_vm0 = vmmov (!%p197_p6), 0   ;;  %s1472_s6 = smul.u32 (!%p197_p6), 13, %s1445_s21  ;;  %vm290_vm1 = vcmask (!%p197_p6), 261120  }
   0xb   : > { %200 = sbr.rel (%p197_p6) target bundleno = 883 (0x373), region = 40  ;;  %1062 = vmatprep.subr.bf16.mxu0 (!%p197_p6), %v1400_v1  ;;  %1138 = vmatprep.subr.bf16.mxu1 (!%p197_p6), %v1400_v1  ;;  %v1248_v3 = vld [vmem:[%s1854_s3] sm:$0xff] (!%p197_p6)   ;;  %v1249_v4 = vld [vmem:[%s1854_s3 + $0x8] sm:$0xff] (!%p197_p6)   ;;  %v1250_v8 = vld [vmem:[%s1854_s3 + $0x10] sm:$0xff] (!%p197_p6)   ;;  %vm579_vm2 = vcmask (!%p197_p6), 130048   ;;  %s224_s14 = sand.u32 (!%p197_p6), 1, %s1358_s18  }
   0xc   : > { %1063 = vmatpush3.bf16.msra.mxu0 (!%p197_p6), %v1246_v0  ;;  %1066 = vmatprep.mubr.msk.bf16.mxu0 (!%p197_p6), %vm1401_vm0, %v1400_v1  ;;  %p232_p7 = scmp.lt.s32.totalorder (!%p197_p6), %s1472_s6, 24  ;;  %v1251_v11 = vld [vmem:[%s1854_s3 + $0x18] sm:$0xff] (!%p197_p6)   ;;  %v1252_v13 = vld [vmem:[%s1854_s3 + $0x20] sm:$0xff] (!%p197_p6)   ;;  %v1253_v16 = vld [vmem:[%s1854_s3 + $0x28] sm:$0xff] (!%p197_p6)  }
   0xd   : > { %1064 = vmatprep.subr.bf16.mxu0 (!%p197_p6), %v1400_v1  ;;  %1114 = vmatprep.mubr.msk.bf16.mxu1 (!%p197_p6), %vm1401_vm0, %v1400_v1  ;;  %v1254_v29 = vld [vmem:[%s1854_s3 + $0x30] sm:$0xff] (!%p197_p6)   ;;  %v1255_v30 = vld [vmem:[%s1854_s3 + $0x38] sm:$0xff] (!%p197_p6)   ;;  %v1560_v31 = vld [vmem:[%s1853_s2] ss:$0 sm:$0xff] (!%p197_p6) }
   0xe   : > { %1146 = vmatpush3.bf16.msra.mxu1 (!%p197_p6), %v1248_v3 }
   0xf   : > { %1139 = vmatprep.subr.bf16.mxu1 (!%p197_p6), %v1400_v1 }
  0x10   : > { %1065 = vmatpush3.bf16.msra.mxu0 (!%p197_p6), %v1247_v2 }
  0x11   : > { %1094 = vmatprep.subr.bf16.mxu0 (!%p197_p6), %v1400_v1 }
  0x12   : > { %s233_s9 = scalar_select %p232_p7, %s1472_s6, 24  ;;  %1147 = vmatpush3.bf16.msra.mxu1 %v1249_v4 }
  0x13   : > { %1140 = vmatprep.subr.bf16.mxu1 %v1400_v1  ;;  %s744_s18 = ssub.s32 (%p1457_p4), 25, %s1472_s6  ;;  %s1037_s17 = smul.u32 (%p1457_p4), 104, %s1445_s21 }
  0x14   : > { %s1005_s12 = sshll.u32 %s233_s9, 3  ;;  %p745_p8 = scmp.lt.s32.totalorder (%p1457_p4), %s744_s18, 13 }
  0x15   : > { %s1490_s15 = scalar_lea.vmem %s1851_s0, %s1005_s12  ;;  %s1769_s24 = scalar_lea.vmem (%p1457_p4), %s1856_s5, %s1037_s17  }
  0x16   : > { %v247_v5 = vld [vmem:[%s1490_s15] sm:$0xff]  ;;  %v248_v6 = vld [vmem:[%s1490_s15 + $0x8] sm:$0xff]  ;;  %1148 = vmatpush3.bf16.msra.mxu1 %v1250_v8  ;;  %v249_v9 = vld [vmem:[%s1490_s15 + $0x10] sm:$0xff] }
  0x17   : > { %v260_v7 = vpack.c.bf16 %v248_v6, %v247_v5  ;;  %v250_v10 = vld [vmem:[%s1490_s15 + $0x18] sm:$0xff]  ;;  %1141 = vmatprep.subr.bf16.mxu1 %v1400_v1  ;;  %v251_v14 = vld [vmem:[%s1490_s15 + $0x20] sm:$0xff]  ;;  %v252_v15 = vld [vmem:[%s1490_s15 + $0x28] sm:$0xff] }
  0x18   : > { %v261_v12 = vpack.c.bf16 %v250_v10, %v249_v9  ;;  %v262_v17 = vpack.c.bf16 %v252_v15, %v251_v14  ;;  %v253_v18 = vld [vmem:[%s1490_s15 + $0x30] sm:$0xff]  ;;  %v254_v19 = vld [vmem:[%s1490_s15 + $0x38] sm:$0xff]  ;;  %v255_v21 = vld [vmem:[%s1490_s15 + $0x40] sm:$0xff] }
  0x19   : > { %1067 = vmatmul.mubr.msk.bf16.vlgmr.msra.gmra.mrb[0].mxu0 %vm290_vm1, %v260_v7  ;;  %v263_v20 = vpack.c.bf16 %v254_v19, %v253_v18  ;;  %v256_v22 = vld [vmem:[%s1490_s15 + $0x48] sm:$0xff]  ;;  %v257_v24 = vld [vmem:[%s1490_s15 + $0x50] sm:$0xff]  ;;  %v258_v25 = vld [vmem:[%s1490_s15 + $0x58] sm:$0xff] }
  0x1a   : > { %1070 = vmatprep.mubr.msk.bf16.mxu0 %vm1401_vm0, %v1400_v1  ;;  %1095 = vmatpush3.bf16.msra.mxu0 %v1248_v3  ;;  %v264_v23 = vpack.c.bf16 %v256_v22, %v255_v21  ;;  %v265_v26 = vpack.c.bf16 %v258_v25, %v257_v24  ;;  %v259_v27 = vld [vmem:[%s1490_s15 + $0x60] sm:$0xff]  ;;  %s1154_s15 = smul.u32 104, %s224_s14 }
  0x1b   : > { %1096 = vmatprep.subr.bf16.mxu0 %v1400_v1  ;;  %1149 = vmatpush3.bf16.msra.mxu1 %v1251_v11  ;;  %v266_v28 = vpack.c.bf16 %v259_v27, %v259_v27 }
  0x1c   : > { %1142 = vmatprep.subr.bf16.mxu1 %v1400_v1  ;;  %s1722_s16 = scalar_lea.vmem [#allocation2], %s1154_s15  }
  0x1e   : > { %1097 = vmatpush3.bf16.msra.mxu0 %v1249_v4 }
  0x1f   : > { %1098 = vmatprep.subr.bf16.mxu0 %v1400_v1  ;;  %1150 = vmatpush3.bf16.msra.mxu1 %v1252_v13 }
  0x20   : > { %1143 = vmatprep.subr.bf16.mxu1 %v1400_v1 }
  0x21   : > { %1071 = vmatmul.mubr.msk.bf16.gmra.mrb[4].mxu0 %vm290_vm1, %v261_v12 }
  0x22   : > { %1074 = vmatprep.mubr.msk.bf16.mxu0 %vm1401_vm0, %v1400_v1  ;;  %1099 = vmatpush3.bf16.msra.mxu0 %v1250_v8 }
  0x23   : > { %1100 = vmatprep.subr.bf16.mxu0 %v1400_v1  ;;  %1151 = vmatpush3.bf16.msra.mxu1 %v1253_v16 }
  0x24   : > { %1144 = vmatprep.subr.bf16.mxu1 %v1400_v1 }
  0x26   : > { %1101 = vmatpush3.bf16.msra.mxu0 %v1251_v11 }
  0x27   : > { %1102 = vmatprep.subr.bf16.mxu0 %v1400_v1  ;;  %1152 = vmatpush3.bf16.msra.mxu1 %v1254_v29 }
  0x28   : > { %1145 = vmatprep.subr.bf16.mxu1 %v1400_v1 }
  0x29   : > { %1075 = vmatmul.mubr.msk.bf16.gmra.mrb[8].mxu0 %vm290_vm1, %v262_v17 }
  0x2a   : > { %1078 = vmatprep.mubr.msk.bf16.mxu0 %vm1401_vm0, %v1400_v1  ;;  %1103 = vmatpush3.bf16.msra.mxu0 %v1252_v13 }
  0x2b   : > { %1104 = vmatprep.subr.bf16.mxu0 %v1400_v1  ;;  %1153 = vmatpush3.bf16.msra.mxu1 %v1255_v30 }
  0x2e   : > { %1105 = vmatpush3.bf16.msra.mxu0 %v1253_v16 }
  0x2f   : > { %1106 = vmatprep.subr.bf16.mxu0 %v1400_v1 }
  0x31   : > { %1079 = vmatmul.mubr.msk.bf16.gmra.mrb[12].mxu0 %vm290_vm1, %v263_v20 }
  0x32   : > { %1082 = vmatprep.mubr.msk.bf16.mxu0 %vm1401_vm0, %v1400_v1  ;;  %1107 = vmatpush3.bf16.msra.mxu0 %v1254_v29 }
  0x33   : > { %1108 = vmatprep.subr.bf16.mxu0 %v1400_v1 }
  0x36   : > { %1109 = vmatpush3.bf16.msra.mxu0 %v1255_v30  ;;  %v1588_v30 = vld [vmem:[%s1855_s4] ss:$0 sm:$0xff] }
  0x39   : > { %1083 = vmatmul.mubr.msk.bf16.gmra.mrb[16].mxu0 %vm290_vm1, %v264_v23 }
  0x3a   : > { %1086 = vmatprep.mubr.msk.bf16.mxu0 %vm1401_vm0, %v1400_v1 }
  0x41   : > { %1087 = vmatmul.mubr.msk.bf16.gmra.mrb[20].mxu0 %vm290_vm1, %v265_v26 }
  0x42   : > { %1090 = vmatprep.mubr.msk.bf16.mxu0 %vm1401_vm0, %v1400_v1 }
  0x49   : > { %1091 = vmatmul.mubr.msk.bf16.gmra.mrb[24].mxu0 %vm290_vm1, %v266_v28 }
  0x4a   : > { %1110 = vmatprep.mubr.msk.bf16.mxu0 %vm1401_vm0, %v1400_v1 }
  0xec   : > { %v346_v32 = vpop.f32.mrb[0].mxu0 }
  0xed   : > { %v347_v33 = vadd.f32 %v1560_v31, %v346_v32  ;;  %v1068_v34 = vpop.f32.mrb[1].mxu0 }
  0xee   : > { %v349_v35 = vpop.f32.mrb[2].mxu0 }
  0xef   : > { %v350_v36 = vadd.f32 %v1560_v31, %v349_v35  ;;  %v1069_v37 = vpop.f32.mrb[3].mxu0  ;;  %v400_v38 = vmax.f32 %v347_v33, 0.0 }
  0xf1   : > { %v401_v39 = vmax.f32 %v350_v36, 0.0 }
  0xf3   : > { %v413_v40 = vpack.c.bf16 %v401_v39, %v400_v38 }
  0xf4   : > { %v354_v41 = vpop.f32.mrb[4].mxu0 }
  0xf5   : > { %v355_v42 = vadd.f32 %v1560_v31, %v354_v41  ;;  %v1072_v43 = vpop.f32.mrb[5].mxu0  ;;  %1111 = vmatmul.mubr.bf16.vlgmr.msra.gmra.mrb[28].mxu0 %v413_v40 }
  0xf6   : > { %v357_v44 = vpop.f32.mrb[6].mxu0 }
  0xf7   : > { %v358_v45 = vadd.f32 %v1560_v31, %v357_v44  ;;  %v1073_v46 = vpop.f32.mrb[7].mxu0  ;;  %v402_v47 = vmax.f32 %v355_v42, 0.0 }
  0xf9   : > { %v403_v48 = vmax.f32 %v358_v45, 0.0 }
  0xfb   : > { %v414_v49 = vpack.c.bf16 %v403_v48, %v402_v47 }
  0xfc   : > { %v362_v50 = vpop.f32.mrb[8].mxu0 }
  0xfd   : > { %v363_v51 = vadd.f32 %v1560_v31, %v362_v50  ;;  %v1076_v52 = vpop.f32.mrb[9].mxu0  ;;  %1115 = vmatmul.mubr.bf16.vlgmr.msra.gmra.mrb[0].mxu1 %v414_v49 }
  0xfe   : > { %v365_v53 = vpop.f32.mrb[10].mxu0  ;;  %1118 = vmatprep.mubr.msk.bf16.mxu1 %vm1401_vm0, %v1400_v1 }
  0xff   : > { %v366_v54 = vadd.f32 %v1560_v31, %v365_v53  ;;  %v1077_v55 = vpop.f32.mrb[11].mxu0  ;;  %v404_v56 = vmax.f32 %v363_v51, 0.0 }
 0x101   : > { %v405_v57 = vmax.f32 %v366_v54, 0.0 }
 0x103   : > { %v415_v58 = vpack.c.bf16 %v405_v57, %v404_v56 }
 0x104   : > { %v370_v59 = vpop.f32.mrb[12].mxu0 }
 0x105   : > { %v371_v60 = vadd.f32 %v1560_v31, %v370_v59  ;;  %v1080_v61 = vpop.f32.mrb[13].mxu0  ;;  %1119 = vmatmul.mubr.bf16.gmra.mrb[4].mxu1 %v415_v58 }
 0x106   : > { %v373_v62 = vpop.f32.mrb[14].mxu0  ;;  %1122 = vmatprep.mubr.msk.bf16.mxu1 %vm1401_vm0, %v1400_v1 }
 0x107   : > { %v374_v63 = vadd.f32 %v1560_v31, %v373_v62  ;;  %v1081_v0 = vpop.f32.mrb[15].mxu0  ;;  %v406_v2 = vmax.f32 %v371_v60, 0.0 }
 0x109   : > { %v407_v3 = vmax.f32 %v374_v63, 0.0 }
 0x10b   : > { %v416_v4 = vpack.c.bf16 %v407_v3, %v406_v2 }
 0x10c   : > { %v378_v5 = vpop.f32.mrb[16].mxu0 }
 0x10d   : > { %v379_v6 = vadd.f32 %v1560_v31, %v378_v5  ;;  %v1084_v7 = vpop.f32.mrb[17].mxu0  ;;  %1123 = vmatmul.mubr.bf16.gmra.mrb[8].mxu1 %v416_v4 }
 0x10e   : > { %v381_v8 = vpop.f32.mrb[18].mxu0  ;;  %1126 = vmatprep.mubr.msk.bf16.mxu1 %vm1401_vm0, %v1400_v1 }
 0x10f   : > { %v382_v9 = vadd.f32 %v1560_v31, %v381_v8  ;;  %v1085_v10 = vpop.f32.mrb[19].mxu0  ;;  %v408_v11 = vmax.f32 %v379_v6, 0.0 }
 0x111   : > { %v409_v12 = vmax.f32 %v382_v9, 0.0 }
 0x113   : > { %v417_v13 = vpack.c.bf16 %v409_v12, %v408_v11 }
 0x114   : > { %v386_v14 = vpop.f32.mrb[20].mxu0 }
 0x115   : > { %v387_v15 = vadd.f32 %v1560_v31, %v386_v14  ;;  %v1088_v16 = vpop.f32.mrb[21].mxu0  ;;  %1127 = vmatmul.mubr.bf16.gmra.mrb[12].mxu1 %v417_v13 }
 0x116   : > { %v389_v17 = vpop.f32.mrb[22].mxu0  ;;  %1130 = vmatprep.mubr.msk.bf16.mxu1 %vm1401_vm0, %v1400_v1 }
 0x117   : > { %v390_v18 = vadd.f32 %v1560_v31, %v389_v17  ;;  %v1089_v19 = vpop.f32.mrb[23].mxu0  ;;  %v410_v20 = vmax.f32 %v387_v15, 0.0 }
 0x119   : > { %v411_v21 = vmax.f32 %v390_v18, 0.0 }
 0x11b   : > { %v418_v22 = vpack.c.bf16 %v411_v21, %v410_v20 }
 0x11c   : > { %v394_v23 = vpop.f32.mrb[24].mxu0 }
 0x11d   : > { %v395_v24 = vadd.f32 %v1560_v31, %v394_v23  ;;  %v1092_v25 = vpop.f32.mrb[25].mxu0  ;;  %1131 = vmatmul.mubr.bf16.gmra.mrb[16].mxu1 %v418_v22 }
 0x11e   : > { %v397_v26 = vpop.f32.mrb[26].mxu0  ;;  %1134 = vmatprep.mubr.msk.bf16.mxu1 %vm1401_vm0, %v1400_v1 }
 0x11f   : > { %v412_v27 = vmax.f32 %v395_v24, 0.0  ;;  %v1093_v28 = vpop.f32.mrb[27].mxu0 }
 0x121   : > { %v419_v29 = vpack.c.bf16 %v412_v27, %v412_v27 }
 0x125   : > { %1135 = vmatmul.mubr.bf16.gmra.mrb[20].mxu1 %v419_v29 }
 0x1c8   : > { %v525_v32 = vpop.f32.mrb[28].mxu0 }
 0x1c9   : > { %v1591_v33 = vadd.f32 %v1588_v30, %v525_v32  ;;  %v1112_v31 = vpop.f32.mrb[29].mxu0 }
 0x1ca   : > { %v528_v34 = vpop.f32.mrb[30].mxu0 }
 0x1cb   : > { %v1594_v35 = vadd.f32 %v1588_v30, %v528_v34  ;;  %v1113_v1 = vpop.f32.mrb[31].mxu0  ;;  %v580_v36 = vsel %vm579_vm2, %v1591_v33, -inf }
 0x1cc   : > { %581 = vmax.xlane.f32.xlu0 %v580_v36 }
 0x1cd   : > { %v583_v37 = vsel %vm579_vm2, %v1594_v35, -inf }
 0x1d0   : > { %v533_v38 = vpop.f32.mrb[0].mxu1  ;;  %584 = vmax.xlane.f32.xlu0 %v583_v37 }
 0x1d1   : > { %v1601_v39 = vadd.f32 %v1588_v30, %v533_v38  ;;  %v1116_v40 = vpop.f32.mrb[1].mxu1 }
 0x1d2   : > { %v536_v41 = vpop.f32.mrb[2].mxu1 }
 0x1d3   : > { %v1604_v42 = vadd.f32 %v1588_v30, %v536_v41  ;;  %v1117_v43 = vpop.f32.mrb[3].mxu1  ;;  %v586_v44 = vsel %vm579_vm2, %v1601_v39, -inf }
 0x1d4   : > { %587 = vmax.xlane.f32.xlu1 %v586_v44 }
 0x1d5   : > { %v589_v45 = vsel %vm579_vm2, %v1604_v42, -inf }
 0x1d8   : > { %590 = vmax.xlane.f32.xlu1 %v589_v45  ;;  %v541_v46 = vpop.f32.mrb[4].mxu1 }
 0x1d9   : > { %v1611_v47 = vadd.f32 %v1588_v30, %v541_v46  ;;  %v1120_v48 = vpop.f32.mrb[5].mxu1 }
 0x1da   : > { %v544_v49 = vpop.f32.mrb[6].mxu1 }
 0x1db   : > { %v1614_v50 = vadd.f32 %v1588_v30, %v544_v49  ;;  %v1121_v51 = vpop.f32.mrb[7].mxu1  ;;  %v592_v52 = vsel %vm579_vm2, %v1611_v47, -inf }
 0x1dc   : > { %593 = vmax.xlane.f32.xlu0 %v592_v52 }
 0x1dd   : > { %v595_v53 = vsel %vm579_vm2, %v1614_v50, -inf }
 0x1de   : > { %596 = vmax.xlane.f32.xlu1 %v595_v53 }
 0x1e0   : > { %v549_v54 = vpop.f32.mrb[8].mxu1 }
 0x1e1   : > { %v1621_v55 = vadd.f32 %v1588_v30, %v549_v54  ;;  %v1124_v56 = vpop.f32.mrb[9].mxu1 }
 0x1e2   : > { %v552_v57 = vpop.f32.mrb[10].mxu1 }
 0x1e3   : > { %v1624_v58 = vadd.f32 %v1588_v30, %v552_v57  ;;  %v1125_v59 = vpop.f32.mrb[11].mxu1  ;;  %v598_v60 = vsel %vm579_vm2, %v1621_v55, -inf }
 0x1e4   : > { %599 = vmax.xlane.f32.xlu0 %v598_v60 }
 0x1e5   : > { %v601_v61 = vsel %vm579_vm2, %v1624_v58, -inf }
 0x1e6   : > { %602 = vmax.xlane.f32.xlu1 %v601_v61 }
 0x1e8   : > { %v557_v62 = vpop.f32.mrb[12].mxu1 }
 0x1e9   : > { %v1631_v63 = vadd.f32 %v1588_v30, %v557_v62  ;;  %v1128_v0 = vpop.f32.mrb[13].mxu1 }
 0x1ea   : > { %v560_v2 = vpop.f32.mrb[14].mxu1 }
 0x1eb   : > { %v1634_v3 = vadd.f32 %v1588_v30, %v560_v2  ;;  %v1129_v4 = vpop.f32.mrb[15].mxu1  ;;  %v604_v5 = vsel %vm579_vm2, %v1631_v63, -inf }
 0x1ec   : > { %605 = vmax.xlane.f32.xlu0 %v604_v5 }
 0x1ed   : > { %v607_v6 = vsel %vm579_vm2, %v1634_v3, -inf }
 0x1ee   : > { %608 = vmax.xlane.f32.xlu1 %v607_v6 }
 0x1f0   : > { %v565_v7 = vpop.f32.mrb[16].mxu1 }
 0x1f1   : > { %v1641_v8 = vadd.f32 %v1588_v30, %v565_v7  ;;  %v1132_v9 = vpop.f32.mrb[17].mxu1 }
 0x1f2   : > { %v568_v10 = vpop.f32.mrb[18].mxu1 }
 0x1f3   : > { %v1644_v11 = vadd.f32 %v1588_v30, %v568_v10  ;;  %v1133_v12 = vpop.f32.mrb[19].mxu1  ;;  %v610_v13 = vsel %vm579_vm2, %v1641_v8, -inf }
 0x1f4   : > { %611 = vmax.xlane.f32.xlu0 %v610_v13 }
 0x1f5   : > { %v613_v14 = vsel %vm579_vm2, %v1644_v11, -inf }
 0x1f6   : > { %614 = vmax.xlane.f32.xlu1 %v613_v14 }
 0x1f8   : > { %v573_v15 = vpop.f32.mrb[20].mxu1 }
 0x1f9   : > { %v1651_v16 = vadd.f32 %v1588_v30, %v573_v15  ;;  %v1136_v17 = vpop.f32.mrb[21].mxu1 }
 0x1fa   : > { %v576_v18 = vpop.f32.mrb[22].mxu1 }
 0x1fb   : > { %v1137_v19 = vpop.f32.mrb[23].mxu1  ;;  %v616_v20 = vsel %vm579_vm2, %v1651_v16, -inf }
 0x1fc   : > { %617 = vmax.xlane.f32.xlu0 %v616_v20 }
 0x259   : > { %v582_v21 = vpop.xlane.xlu0 %581 }
 0x25a   : > { %v619_v22 = vsub.f32 %v1591_v33, %v582_v21 }
 0x25c   : > { %v632_v23 = vmul.f32 1.442695, %v619_v22 }
 0x25d   : > { %v585_v24 = vpop.xlane.xlu0 %584 }
 0x25e   : > { %1256 = vpow2.f32 %v632_v23  ;;  %v620_v25 = vsub.f32 %v1594_v35, %v585_v24 }
 0x260   : > { %v634_v26 = vmul.f32 1.442695, %v620_v25 }
 0x261   : > { %v588_v27 = vpop.xlane.xlu1 %587 }
 0x262   : > { %1258 = vpow2.f32 %v634_v26  ;;  %v621_v28 = vsub.f32 %v1601_v39, %v588_v27 }
 0x264   : > { %v636_v29 = vmul.f32 1.442695, %v621_v28 }
 0x265   : > { %v591_v30 = vpop.xlane.xlu1 %590 }
 0x266   : > { %1260 = vpow2.f32 %v636_v29  ;;  %v622_v32 = vsub.f32 %v1604_v42, %v591_v30 }
 0x268   : > { %v1659_v31 = vpop.eup %1256  ;;  %v638_v34 = vmul.f32 1.442695, %v622_v32 }
 0x269   : > { %v594_v1 = vpop.xlane.xlu0 %593  ;;  %v658_v33 = vsel %vm579_vm2, %v1659_v31, 0.0 }
 0x26a   : > { %1262 = vpow2.f32 %v638_v34  ;;  %v623_v35 = vsub.f32 %v1611_v47, %v594_v1  ;;  %659 = vadd.xlane.f32.xlu1 %v658_v33 }
 0x26b   : > { %v597_v36 = vpop.xlane.xlu1 %596 }
 0x26c   : > { %v1664_v37 = vpop.eup %1258  ;;  %v640_v38 = vmul.f32 1.442695, %v623_v35  ;;  %v624_v39 = vsub.f32 %v1614_v50, %v597_v36 }
 0x26d   : > { %v661_v40 = vsel %vm579_vm2, %v1664_v37, 0.0 }
 0x26e   : > { %1264 = vpow2.f32 %v640_v38  ;;  %v642_v41 = vmul.f32 1.442695, %v624_v39  ;;  %662 = vadd.xlane.f32.xlu0 %v661_v40 }
 0x270   : > { %v1669_v42 = vpop.eup %1260  ;;  %1266 = vpow2.f32 %v642_v41 }
 0x271   : > { %v600_v43 = vpop.xlane.xlu0 %599  ;;  %v664_v44 = vsel %vm579_vm2, %v1669_v42, 0.0 }
 0x272   : > { %v625_v45 = vsub.f32 %v1621_v55, %v600_v43  ;;  %665 = vadd.xlane.f32.xlu1 %v664_v44 }
 0x273   : > { %v603_v46 = vpop.xlane.xlu1 %602 }
 0x274   : > { %v1674_v47 = vpop.eup %1262  ;;  %v644_v48 = vmul.f32 1.442695, %v625_v45  ;;  %v626_v49 = vsub.f32 %v1624_v58, %v603_v46 }
 0x275   : > { %v667_v50 = vsel %vm579_vm2, %v1674_v47, 0.0 }
 0x276   : > { %1268 = vpow2.f32 %v644_v48  ;;  %v646_v51 = vmul.f32 1.442695, %v626_v49  ;;  %668 = vadd.xlane.f32.xlu0 %v667_v50 }
 0x278   : > { %v1679_v52 = vpop.eup %1264  ;;  %1270 = vpow2.f32 %v646_v51 }
 0x279   : > { %v606_v53 = vpop.xlane.xlu0 %605  ;;  %v670_v54 = vsel %vm579_vm2, %v1679_v52, 0.0 }
 0x27a   : > { %v1683_v55 = vpop.eup %1266  ;;  %v627_v56 = vsub.f32 %v1631_v63, %v606_v53  ;;  %671 = vadd.xlane.f32.xlu1 %v670_v54 }
 0x27b   : > { %v609_v57 = vpop.xlane.xlu1 %608  ;;  %v673_v58 = vsel %vm579_vm2, %v1683_v55, 0.0 }
 0x27c   : > { %v648_v59 = vmul.f32 1.442695, %v627_v56  ;;  %v628_v60 = vsub.f32 %v1634_v3, %v609_v57  ;;  %674 = vadd.xlane.f32.xlu0 %v673_v58 }
 0x27e   : > { %1272 = vpow2.f32 %v648_v59  ;;  %v650_v61 = vmul.f32 1.442695, %v628_v60 }
 0x280   : > { %v1689_v62 = vpop.eup %1268  ;;  %1274 = vpow2.f32 %v650_v61 }
 0x281   : > { %v612_v0 = vpop.xlane.xlu0 %611  ;;  %v676_v2 = vsel %vm579_vm2, %v1689_v62, 0.0 }
 0x282   : > { %v1693_v4 = vpop.eup %1270  ;;  %v629_v63 = vsub.f32 %v1641_v8, %v612_v0  ;;  %677 = vadd.xlane.f32.xlu1 %v676_v2 }
 0x283   : > { %v615_v5 = vpop.xlane.xlu1 %614  ;;  %v679_v6 = vsel %vm579_vm2, %v1693_v4, 0.0 }
 0x284   : > { %v652_v3 = vmul.f32 1.442695, %v629_v63  ;;  %v630_v7 = vsub.f32 %v1644_v11, %v615_v5  ;;  %680 = vadd.xlane.f32.xlu0 %v679_v6 }
 0x286   : > { %1276 = vpow2.f32 %v652_v3  ;;  %v654_v9 = vmul.f32 1.442695, %v630_v7 }
 0x288   : > { %v1699_v10 = vpop.eup %1272  ;;  %1278 = vpow2.f32 %v654_v9 }
 0x289   : > { %v618_v12 = vpop.xlane.xlu0 %617  ;;  %v682_v13 = vsel %vm579_vm2, %v1699_v10, 0.0 }
 0x28a   : > { %v1703_v14 = vpop.eup %1274  ;;  %v631_v8 = vsub.f32 %v1651_v16, %v618_v12  ;;  %683 = vadd.xlane.f32.xlu1 %v682_v13 }
 0x28b   : > { %v685_v15 = vsel %vm579_vm2, %v1703_v14, 0.0 }
 0x28c   : > { %v656_v11 = vmul.f32 1.442695, %v631_v8  ;;  %686 = vadd.xlane.f32.xlu0 %v685_v15 }
 0x28e   : > { %1280 = vpow2.f32 %v656_v11 }
 0x290   : > { %v1708_v17 = vpop.eup %1276 }
 0x291   : > { %v688_v18 = vsel %vm579_vm2, %v1708_v17, 0.0 }
 0x292   : > { %v1712_v19 = vpop.eup %1278  ;;  %689 = vadd.xlane.f32.xlu1 %v688_v18 }
 0x293   : > { %v691_v20 = vsel %vm579_vm2, %v1712_v19, 0.0 }
 0x294   : > { %692 = vadd.xlane.f32.xlu0 %v691_v20 }
 0x298   : > { %v1716_v16 = vpop.eup %1280 }
 0x299   : > { %v694_v21 = vsel %vm579_vm2, %v1716_v16, 0.0 }
 0x29a   : > { %695 = vadd.xlane.f32.xlu1 %v694_v21 }
 0x2f7   : > { %v660_v22 = vpop.xlane.xlu1 %659 }
 0x2f8   : > { %1282 = vrcp.f32 %v660_v22 }
 0x2fb   : > { %v663_v23 = vpop.xlane.xlu0 %662 }
 0x2fc   : > { %1284 = vrcp.f32 %v663_v23 }
 0x2ff   : > { %v666_v24 = vpop.xlane.xlu1 %665 }
 0x300   : > { %1286 = vrcp.f32 %v666_v24 }
 0x302   : > { %v1283_v25 = vpop.eup %1282 }
 0x303   : > { %v698_v26 = vmul.f32 %v1283_v25, %v1659_v31  ;;  %v669_v27 = vpop.xlane.xlu0 %668 }
 0x304   : > { %1288 = vrcp.f32 %v669_v27 }
 0x305   : > { %723 = vst.msk [vmem:[%s1722_s16] sm:$0xff] %vm579_vm2, %v698_v26 }
 0x306   : > { %v1285_v28 = vpop.eup %1284 }
 0x307   : > { %v700_v29 = vmul.f32 %v1285_v28, %v1664_v37  ;;  %v672_v30 = vpop.xlane.xlu1 %671 }
 0x308   : > { %1290 = vrcp.f32 %v672_v30 }
 0x309   : > { %724 = vst.msk [vmem:[%s1722_s16 + $0x8] sm:$0xff] %vm579_vm2, %v700_v29  ;;  %v675_v32 = vpop.xlane.xlu0 %674 }
 0x30a   : > { %v1287_v31 = vpop.eup %1286  ;;  %1292 = vrcp.f32 %v675_v32 }
 0x30b   : > { %v702_v34 = vmul.f32 %v1287_v31, %v1669_v42 }
 0x30d   : > { %725 = vst.msk [vmem:[%s1722_s16 + $0x10] sm:$0xff] %vm579_vm2, %v702_v34 }
 0x30e   : > { %v1289_v1 = vpop.eup %1288 }
 0x30f   : > { %v704_v33 = vmul.f32 %v1289_v1, %v1674_v47  ;;  %v678_v35 = vpop.xlane.xlu1 %677 }
 0x310   : > { %1294 = vrcp.f32 %v678_v35 }
 0x311   : > { %726 = vst.msk [vmem:[%s1722_s16 + $0x18] sm:$0xff] %vm579_vm2, %v704_v33  ;;  %v681_v36 = vpop.xlane.xlu0 %680 }
 0x312   : > { %v1291_v37 = vpop.eup %1290  ;;  %1296 = vrcp.f32 %v681_v36 }
 0x313   : > { %v706_v38 = vmul.f32 %v1291_v37, %v1679_v52 }
 0x314   : > { %v1293_v39 = vpop.eup %1292 }
 0x315   : > { %727 = vst.msk [vmem:[%s1722_s16 + $0x20] sm:$0xff] %vm579_vm2, %v706_v38  ;;  %v708_v40 = vmul.f32 %v1293_v39, %v1683_v55 }
 0x317   : > { %728 = vst.msk [vmem:[%s1722_s16 + $0x28] sm:$0xff] %vm579_vm2, %v708_v40  ;;  %v684_v41 = vpop.xlane.xlu1 %683 }
 0x318   : > { %1298 = vrcp.f32 %v684_v41 }
 0x319   : > { %v687_v42 = vpop.xlane.xlu0 %686 }
 0x31a   : > { %v1295_v43 = vpop.eup %1294  ;;  %1300 = vrcp.f32 %v687_v42 }
 0x31b   : > { %v710_v44 = vmul.f32 %v1295_v43, %v1689_v62 }
 0x31c   : > { %v1297_v45 = vpop.eup %1296 }
 0x31d   : > { %729 = vst.msk [vmem:[%s1722_s16 + $0x30] sm:$0xff] %vm579_vm2, %v710_v44  ;;  %v712_v46 = vmul.f32 %v1297_v45, %v1693_v4 }
 0x31f   : > { %730 = vst.msk [vmem:[%s1722_s16 + $0x38] sm:$0xff] %vm579_vm2, %v712_v46  ;;  %v690_v47 = vpop.xlane.xlu1 %689 }
 0x320   : > { %1302 = vrcp.f32 %v690_v47 }
 0x321   : > { %v693_v48 = vpop.xlane.xlu0 %692 }
 0x322   : > { %v1299_v49 = vpop.eup %1298  ;;  %1304 = vrcp.f32 %v693_v48 }
 0x323   : > { %v714_v50 = vmul.f32 %v1299_v49, %v1699_v10 }
 0x324   : > { %v1301_v51 = vpop.eup %1300 }
 0x325   : > { %731 = vst.msk [vmem:[%s1722_s16 + $0x40] sm:$0xff] %vm579_vm2, %v714_v50  ;;  %v716_v52 = vmul.f32 %v1301_v51, %v1703_v14 }
 0x327   : > { %732 = vst.msk [vmem:[%s1722_s16 + $0x48] sm:$0xff] %vm579_vm2, %v716_v52  ;;  %v696_v53 = vpop.xlane.xlu1 %695 }
 0x328   : > { %1306 = vrcp.f32 %v696_v53 }
 0x32a   : > { %v1303_v54 = vpop.eup %1302 }
 0x32b   : > { %v718_v55 = vmul.f32 %v1303_v54, %v1708_v17 }
 0x32c   : > { %v1305_v56 = vpop.eup %1304 }
 0x32d   : > { %733 = vst.msk [vmem:[%s1722_s16 + $0x50] sm:$0xff] %vm579_vm2, %v718_v55  ;;  %v720_v57 = vmul.f32 %v1305_v56, %v1712_v19 }
 0x32f   : > { %734 = vst.msk [vmem:[%s1722_s16 + $0x58] sm:$0xff] %vm579_vm2, %v720_v57  ;;  %742 = sbr.rel (!%p1457_p4) target bundleno = 883 (0x373), region = 44 }
 0x332   : > { %v1307_v58 = vpop.eup %1306 }
 0x333   : > { %v722_v59 = vmul.f32 %v1307_v58, %v1716_v16 }
 0x335   : > { %735 = vst.msk [vmem:[%s1722_s16 + $0x60] sm:$0xff] %vm579_vm2, %v722_v59 }
 0x336   : > { %s1865_s18 = smov (!%p745_p8, %s744_s18), 13 }
 0x337   : > { %s1025_s27 = sshll.u32 %s1865_s18, 7 }
 0x338   : > { %p1028_p9 = scmp.eq.s32.totalorder %s1025_s27, 0 }
 0x339   : > { %1308 = sdivrem.u32 (!%p1028_p9), %s1865_s18, 13 }
 0x33a   : > { %753 = sbr.rel (%p1028_p9) target bundleno = 883 (0x373), region = 48 }
 0x342   : > { %s1775_s26 = spop.drf %1308 }
 0x343   : > { %p1029_p10 = scmp.le.s32.totalorder %s1775_s26, 0 }
 0x344   : > { %s1858_s21 = smov (!%p1029_p10), %s1769_s24  ;;  %s1859_s6 = smov (!%p1029_p10), %s1722_s16 }
 0x345   : > { %957 = sbr.rel (%p1029_p10) target bundleno = 854 (0x356), region = 124  ;;  %s1784_s28 = smov (!%p1029_p10), 0  }
 0x346   : > { %s1786_s29 = smov (!%p1029_p10), 0  }
 0x34c LB: >> { %v841_v60 = vld [vmem:[%s1374_s6] sm:$0xff]  ;;  %v843_v61 = vld [vmem:[%s1374_s6 + $0x8] sm:$0xff]  ;;  %v845_v62 = vld [vmem:[%s1374_s6 + $0x10] sm:$0xff]  ;;  %s867_s30 = sadd.s32 1, %s1378_s28  ;;  %s835_s29 = sadd.s32 1, %s1382_s29   ;;  %s1382_s29 = sphi %s1786_s29, %s835_s29   ;;  %s1378_s28 = sphi %s1784_s28, %s1860_s28   ;;  %s1374_s6 = sphi %s1859_s6, %s872_s6   ;;  %s1370_s21 = sphi %s1858_s21, %s873_s21  }
 0x34d   : >> { %842 = vst [vmem:[%s1370_s21] sm:$0xff] %v841_v60  ;;  %844 = vst [vmem:[%s1370_s21 + $0x8] sm:$0xff] %v843_v61  ;;  %v847_v0 = vld [vmem:[%s1374_s6 + $0x18] sm:$0xff]  ;;  %v849_v2 = vld [vmem:[%s1374_s6 + $0x20] sm:$0xff]  ;;  %p868_p11 = scmp.ge.s32.totalorder %s867_s30, %s1775_s26  ;;  %p834_p12 = scmp.ge.s32.totalorder %s835_s29, %s1775_s26 }
 0x34e   : >> { %846 = vst [vmem:[%s1370_s21 + $0x10] sm:$0xff] %v845_v62  ;;  %v851_v4 = vld [vmem:[%s1374_s6 + $0x28] sm:$0xff]  ;;  %848 = vst [vmem:[%s1370_s21 + $0x18] sm:$0xff] %v847_v0  ;;  %v853_v63 = vld [vmem:[%s1374_s6 + $0x30] sm:$0xff] }
 0x34f   : >> { %850 = vst [vmem:[%s1370_s21 + $0x20] sm:$0xff] %v849_v2  ;;  %852 = vst [vmem:[%s1370_s21 + $0x28] sm:$0xff] %v851_v4  ;;  %v855_v5 = vld [vmem:[%s1374_s6 + $0x38] sm:$0xff]  ;;  %v857_v6 = vld [vmem:[%s1374_s6 + $0x40] sm:$0xff]  ;;  %s1867_s30 = smov (%p868_p11, %s867_s30), 0  ;;  %837 = sbr.rel (!%p834_p12) target bundleno = 844 (0x34c), region = 130 }
 0x350   : >> { %854 = vst [vmem:[%s1370_s21 + $0x30] sm:$0xff] %v853_v63  ;;  %856 = vst [vmem:[%s1370_s21 + $0x38] sm:$0xff] %v855_v5  ;;  %v859_v3 = vld [vmem:[%s1374_s6 + $0x48] sm:$0xff]  ;;  %v861_v7 = vld [vmem:[%s1374_s6 + $0x50] sm:$0xff]  ;;  %s870_s7 = smul.u32 104, %s1867_s30  ;;  %s1860_s28 = smov %s1867_s30 }
 0x351   : >> { %858 = vst [vmem:[%s1370_s21 + $0x40] sm:$0xff] %v857_v6  ;;  %v863_v9 = vld [vmem:[%s1374_s6 + $0x58] sm:$0xff]  ;;  %860 = vst [vmem:[%s1370_s21 + $0x48] sm:$0xff] %v859_v3  ;;  %v865_v10 = vld [vmem:[%s1374_s6 + $0x60] sm:$0xff] }
 0x352   : >> { %862 = vst [vmem:[%s1370_s21 + $0x50] sm:$0xff] %v861_v7  ;;  %864 = vst [vmem:[%s1370_s21 + $0x58] sm:$0xff] %v863_v9  ;;  %s872_s6 = scalar_lea.vmem %s1722_s16, %s870_s7 [#allocation2]  }
 0x353   : >> { %866 = vst [vmem:[%s1370_s21 + $0x60] sm:$0xff] %v865_v10  ;;  %s873_s21 = scalar_lea.vmem %s1769_s24, %s870_s7  }
 0x356 PF: > { %1310 = sdivrem.u32 %s1865_s18, 13 }
 0x357   : > { %s1030_s8 = smul.u32 104, %s1775_s26 }
 0x359   : > { %s878_s9 = scalar_lea.vmem %s1722_s16, %s1030_s8 [#allocation2]   ;;  %s880_s10 = scalar_lea.vmem %s1769_s24, %s1030_s8  }
 0x35f   : > { %s1311_s11 = spop.drf %1310 }
 0x360   : > { %p1032_p13 = scmp.le.s32.totalorder %s1311_s11, 0 }
 0x361   : > { %s1384_s12 = smov (!%p1032_p13), %s880_s10   ;;  %s1388_s13 = smov (!%p1032_p13), %s878_s9  }
 0x362   : > { %971 = sbr.rel (%p1032_p13) target bundleno = 883 (0x373), region = 135  ;;  %s1392_s14 = smov (!%p1032_p13), 0  }
 0x363   : > { %s1396_s15 = smov (!%p1032_p13), 0  }
 0x369 LB: >> { %v890_v12 = vld [vmem:[%s1390_s13] sm:$0xff]  ;;  %s892_s17 = sadd.s32 1, %s1394_s14  ;;  %s884_s15 = sadd.s32 1, %s1398_s15   ;;  %s1398_s15 = sphi %s1396_s15, %s884_s15   ;;  %s1394_s14 = sphi %s1392_s14, %s1393_s14   ;;  %s1390_s13 = sphi %s1388_s13, %s897_s13   ;;  %s1386_s12 = sphi %s1384_s12, %s898_s12  }
 0x36a   : >> { %891 = vst [vmem:[%s1386_s12] sm:$0xff] %v890_v12  ;;  %p893_p0 = scmp.ge.s32.totalorder %s892_s17, %s1311_s11  ;;  %p883_p1 = scmp.ge.s32.totalorder %s884_s15, %s1311_s11 }
 0x36c   : >> { %s1869_s17 = smov (%p893_p0, %s892_s17), 0  ;;  %886 = sbr.rel (!%p883_p1) target bundleno = 873 (0x369), region = 141 }
 0x36d   : >> { %s1033_s16 = sshll.u32 %s1869_s17, 3  ;;  %s1393_s14 = smov %s1869_s17  }
 0x36e   : >> { %s897_s13 = scalar_lea.vmem %s878_s9, %s1033_s16 [#allocation2]   ;;  %s898_s12 = scalar_lea.vmem %s880_s10, %s1033_s16  }
 0x373 PF: > { %p12_p2 = scmp.ge.s32.totalorder %s1447_s22, 4   ;;  %s1861_s18 = smov %s1362_s19 }
 0x374   : > { %s1862_s19 = smov %s1455_s25  ;;  %s1863_s20 = smov %s1447_s22 }
 0x375   :  { %14 = sbr.rel (!%p12_p2) target bundleno = 2 (0x2), region = 152 }

</bundles_post_ra>
